<compile_context>
chip_gen: v6e
topology: v6e:2x2x1
jax: 0.10.0
libtpu: 0.0.40
codegen_flags: <defaults>
</compile_context>

<pallas_src>
import functools

import jax
import jax.numpy as jnp
from jax import lax
from jax.experimental import pallas as pl
from jax.experimental.pallas import tpu as pltpu


# ------------------------------ Pallas kernels -------------------------------


def _merge_ln_reduce_kernel(x_ref, w_ref, b_ref, o_ref, *, eps):
    """Fused path: 2x2 merge + LayerNorm + reduction, gather done in VMEM.

    x_ref: (TR, 2, w2, 2C)   raw input rows (row-pairs of the padded feature map)
    w_ref: (4C, 2C)          LN-scale-folded reduction weight, rows in (h_par, w_par, c) order
    b_ref: (1, 2C)  f32      folded LN-shift bias (beta @ W.T)
    o_ref: (TR*w2, 2C)
    """
    tr, _, w2, cc = x_ref.shape
    rows = tr * w2
    # Parity split (VMEM-local) + free row collapse (w2 % 8 == 0 on this path).
    x0 = x_ref[:, 0, :, :].astype(jnp.float32).reshape(rows, cc)   # h_par = 0
    x1 = x_ref[:, 1, :, :].astype(jnp.float32).reshape(rows, cc)   # h_par = 1
    inv_n = 1.0 / (2 * cc)                                          # 1 / (4C)
    s = jnp.sum(x0, axis=-1, keepdims=True) + jnp.sum(x1, axis=-1, keepdims=True)
    ss = jnp.sum(x0 * x0, axis=-1, keepdims=True) + jnp.sum(x1 * x1, axis=-1, keepdims=True)
    mean = s * inv_n
    var = ss * inv_n - mean * mean                                  # biased, like nn.LayerNorm
    inv = lax.rsqrt(var + eps)
    cdt = w_ref.dtype                                               # bf16 (default) or f32
    y0 = ((x0 - mean) * inv).astype(cdt)
    y1 = ((x1 - mean) * inv).astype(cdt)
    # Split-K matmul: the 4C concat is never materialized; accumulate in f32 on the MXU.
    acc = jnp.dot(y0, w_ref[0:cc, :], preferred_element_type=jnp.float32)
    acc = acc + jnp.dot(y1, w_ref[cc:2 * cc, :], preferred_element_type=jnp.float32)
    o_ref[...] = (acc + b_ref[...]).astype(o_ref.dtype)


def _slab_ln_reduce_kernel(x_ref, w_ref, b_ref, o_ref, *, eps):
    """Fallback path: rows already gathered to (TM, 4C) in (h_par, w_par, c) order."""
    x = x_ref[...].astype(jnp.float32)
    mean = jnp.mean(x, axis=-1, keepdims=True)
    msq = jnp.mean(x * x, axis=-1, keepdims=True)
    inv = lax.rsqrt(msq - mean * mean + eps)
    y = ((x - mean) * inv).astype(w_ref.dtype)
    acc = jnp.dot(y, w_ref[...], preferred_element_type=jnp.float32)
    o_ref[...] = (acc + b_ref[...]).astype(o_ref.dtype)


# ----------------------------- parameter prep --------------------------------


def prepare_params(params, compute_dtype=jnp.bfloat16):
    """Done ONCE (outside the forward): fold LN affine into the reduction weight and
    permute its rows from the PyTorch concat order (w_par, h_par, c) to the natural
    memory order (h_par, w_par, c) used by the kernels."""
    gamma = params["gamma"].astype(jnp.float32)              # (4C,)
    beta = params["beta"].astype(jnp.float32)                # (4C,)
    w_t = params["red_w"].astype(jnp.float32).T              # (4C, 2C), PyTorch row order
    c4 = gamma.shape[0]
    c = c4 // 4
    gw = gamma[:, None] * w_t                                 # fold LN scale
    # PyTorch row index p = (2*w_par + h_par)*C + c  ->  reorder to q = (2*h_par + w_par)*C + c
    gw = gw.reshape(2, 2, c, 2 * c).transpose(1, 0, 2, 3).reshape(c4, 2 * c)
    bias = (beta @ w_t).reshape(1, 2 * c)                     # fold LN shift (order-invariant)
    return {"w": gw.astype(compute_dtype), "b": bias.astype(jnp.float32)}


# --------------------------- module implementation ---------------------------


def donut_swin_patch_merging(prepared, input_feature, input_dimensions, *,
                             eps=1e-5, tile_rows=1024, vmem_budget_bytes=24 * 2**20):
    """Forward pass of DonutSwinPatchMerging.

    prepared: output of prepare_params().
    input_feature: (B, H*W, C);  input_dimensions: (H, W).
    Returns (B, ceil(H/2)*ceil(W/2), 2*C).
    """
    B, L, C = input_feature.shape
    H, W = input_dimensions
    assert L == H * W
    w_f, b_f = prepared["w"], prepared["b"]
    CC = 2 * C
    assert w_f.shape == (2 * CC, CC)

    x = input_feature.reshape(B, H, W, C)
    pad_h, pad_w = H % 2, W % 2
    if pad_h or pad_w:                                        # maybe_pad (copy only when odd)
        x = jnp.pad(x, ((0, 0), (0, pad_h), (0, pad_w), (0, 0)))
    Hp, Wp = H + pad_h, W + pad_w
    h2, w2 = Hp // 2, Wp // 2

    out_dtype = input_feature.dtype
    itemsize = jnp.dtype(out_dtype).itemsize
    resident = 2 * (w_f.size * jnp.dtype(w_f.dtype).itemsize
                    + b_f.size * jnp.dtype(b_f.dtype).itemsize)

    if w2 % 8 == 0:
        # -------- fused-gather fast path: activations read from HBM exactly once --------
        R = B * h2
        x4d = x.reshape(R, 2, w2, CC)                         # free (contiguous) reshape
        tile_r = max(1, min(R, max(1, tile_rows // w2)))      # ~tile_rows merged rows / step
        stream_per_r = (2 * w2 * CC + w2 * CC) * itemsize     # in + out bytes per h2-row
        while tile_r > 1 and 2 * tile_r * stream_per_r + resident > vmem_budget_bytes:
            tile_r = max(1, tile_r // 2)
        est = 2 * tile_r * stream_per_r + resident
        vlim = int(min(64 * 2**20, max(32 * 2**20, 2 * est)))
        out = pl.pallas_call(
            functools.partial(_merge_ln_reduce_kernel, eps=eps),
            out_shape=jax.ShapeDtypeStruct((R * w2, CC), out_dtype),
            grid=(pl.cdiv(R, tile_r),),
            in_specs=[
                pl.BlockSpec((tile_r, 2, w2, CC), lambda i: (i, 0, 0, 0)),  # row-pair tile
                pl.BlockSpec((2 * CC, CC), lambda i: (0, 0)),               # resident weight
                pl.BlockSpec((1, CC), lambda i: (0, 0)),                    # resident bias
            ],
            out_specs=pl.BlockSpec((tile_r * w2, CC), lambda i: (i, 0)),
            compiler_params=pltpu.CompilerParams(
                dimension_semantics=("parallel",),
                vmem_limit_bytes=vlim),
        )(x4d, w_f, b_f)
        return out.reshape(B, h2 * w2, CC)

    # -------- general fallback (w2 not sublane-aligned): gather in the wrapper --------
    # TODO(synk): this path pays one extra HBM pass for the 2x2 gather; only hit when w2 % 8 != 0.
    x4 = (x.reshape(B, h2, 2, w2, 2, C)
           .transpose(0, 1, 3, 2, 4, 5)                       # -> (h_par, w_par, c) channel order
           .reshape(B * h2 * w2, 2 * CC))
    M = x4.shape[0]
    tile_m = max(1, min(M, tile_rows))
    stream_per_m = (2 * CC + CC) * itemsize
    while tile_m > 8 and 2 * tile_m * stream_per_m + resident > vmem_budget_bytes:
        tile_m = max(8, tile_m // 2)
    if tile_m < M:
        tile_m = max(8, (tile_m // 8) * 8)                    # (8,128) sublane rule
    est = 2 * tile_m * stream_per_m + resident
    vlim = int(min(64 * 2**20, max(32 * 2**20, 2 * est)))
    out = pl.pallas_call(
        functools.partial(_slab_ln_reduce_kernel, eps=eps),
        out_shape=jax.ShapeDtypeStruct((M, CC), out_dtype),
        grid=(pl.cdiv(M, tile_m),),
        in_specs=[
            pl.BlockSpec((tile_m, 2 * CC), lambda i: (i, 0)),
            pl.BlockSpec((2 * CC, CC), lambda i: (0, 0)),
            pl.BlockSpec((1, CC), lambda i: (0, 0)),
        ],
        out_specs=pl.BlockSpec((tile_m, CC), lambda i: (i, 0)),
        compiler_params=pltpu.CompilerParams(
            dimension_semantics=("parallel",),
            vmem_limit_bytes=vlim),
    )(x4, w_f, b_f)
    return out.reshape(B, h2 * w2, CC)


# ------------------------------- f32 reference -------------------------------


def reference_forward(params, input_feature, input_dimensions, eps=1e-5):
    B, L, C = input_feature.shape
    H, W = input_dimensions
    x = input_feature.reshape(B, H, W, C)
    if H % 2 or W % 2:
        x = jnp.pad(x, ((0, 0), (0, H % 2), (0, W % 2), (0, 0)))
    f0 = x[:, 0::2, 0::2, :]
    f1 = x[:, 1::2, 0::2, :]
    f2 = x[:, 0::2, 1::2, :]
    f3 = x[:, 1::2, 1::2, :]
    x = jnp.concatenate([f0, f1, f2, f3], axis=-1).reshape(B, -1, 4 * C)
    mean = x.mean(-1, keepdims=True)
    var = ((x - mean) ** 2).mean(-1, keepdims=True)
    y = (x - mean) / jnp.sqrt(var + eps) * params["gamma"] + params["beta"]
    return y @ params["red_w"].T


# ----------------------------------- init ------------------------------------


def init_params(key, dim):
    k1, k2, k3 = jax.random.split(key, 3)
    scale = 0.02
    return {
        "gamma": 1.0 + scale * jax.random.normal(k1, (4 * dim,), jnp.float32),
        "beta": scale * jax.random.normal(k2, (4 * dim,), jnp.float32),
        # nn.Linear(4*dim, 2*dim, bias=False): PyTorch layout (out_features, in_features)
        "red_w": scale * jax.random.normal(k3, (2 * dim, 4 * dim), jnp.float32),
    }


# ----------------------------------- main -------------------------------------


if __name__ == "__main__":
    key = jax.random.PRNGKey(0)
    k_p, k_x1, k_x2 = jax.random.split(key, 3)

    dim = 64                                   # C=64 -> 4C=256 lanes in, 2C=128 lanes out
    params = init_params(k_p, dim)

    # even spatial dims -> fused-gather fast path; tile_rows=64 gives a 2-step parallel grid
    B, H, W = 2, 16, 16
    x = jax.random.normal(k_x1, (B, H * W, dim), jnp.float32)
    ref = reference_forward(params, x, (H, W))

    # f32 MXU path (tight tolerance)
    prep_f32 = prepare_params(params, compute_dtype=jnp.float32)
    out_f32 = jax.block_until_ready(
        donut_swin_patch_merging(prep_f32, x, (H, W), tile_rows=64))
    assert out_f32.shape == (B, (H // 2) * (W // 2), 2 * dim)
    assert jnp.allclose(out_f32, ref, atol=1e-4, rtol=1e-4), "mismatch (even dims, f32)"

    # default bf16 MXU path (stats/accumulation stay f32) -> bf16-level tolerance
    prep_bf16 = prepare_params(params)
    out_bf16 = jax.block_until_ready(
        donut_swin_patch_merging(prep_bf16, x, (H, W)))
    assert jnp.allclose(out_bf16, ref, atol=2e-2, rtol=2e-2), "mismatch (even dims, bf16)"

    # odd spatial dims -> maybe_pad + fallback path (w2 % 8 != 0)
    Ho, Wo = 15, 13
    x_odd = jax.random.normal(k_x2, (B, Ho * Wo, dim), jnp.float32)
    ref_odd = reference_forward(params, x_odd, (Ho, Wo))
    out_odd = jax.block_until_ready(
        donut_swin_patch_merging(prep_f32, x_odd, (Ho, Wo)))
    assert out_odd.shape == (B, ((Ho + 1) // 2) * ((Wo + 1) // 2), 2 * dim)
    assert jnp.allclose(out_odd, ref_odd, atol=1e-4, rtol=1e-4), "mismatch (odd dims)"

    print("KERNEL_OK")
</pallas_src>

<mosaic_0001>
module attributes {stable_mosaic.version = 11 : i64} {
  func.func @_merge_ln_reduce_kernel(%arg0: i32, %arg1: memref<8x2x8x128xf32, #tpu.memory_space<vmem>>, %arg2: memref<256x128xf32, #tpu.memory_space<vmem>>, %arg3: memref<1x128xf32, #tpu.memory_space<vmem>>, %arg4: memref<64x128xf32, #tpu.memory_space<vmem>>) attributes {dimension_semantics = [#tpu.dimension_semantics<parallel>], iteration_bounds = array<i64: 2>, scalar_prefetch = 0 : i64, scratch_operands = 0 : i64, tpu.core_type = #tpu.core_type<tc>, window_params = [{transform_indices = @transform_0, window_bounds = array<i64: 8, 2, 8, 128>}, {pipeline_mode = #tpu.pipeline_mode<synchronous>, transform_indices = @transform_1, window_bounds = array<i64: 256, 128>}, {pipeline_mode = #tpu.pipeline_mode<synchronous>, transform_indices = @transform_2, window_bounds = array<i64: 1, 128>}, {transform_indices = @transform_3, window_bounds = array<i64: 64, 128>}]} {
    %c0 = arith.constant 0 : index
    %c0_0 = arith.constant 0 : index
    %c0_1 = arith.constant 0 : index
    %c0_2 = arith.constant 0 : index
    %0 = vector.load %arg1[%c0, %c0_0, %c0_1, %c0_2] : memref<8x2x8x128xf32, #tpu.memory_space<vmem>>, vector<8x1x8x128xf32>
    %1 = vector.shape_cast %0 : vector<8x1x8x128xf32> to vector<8x8x128xf32>
    %2 = vector.shape_cast %1 : vector<8x8x128xf32> to vector<64x128xf32>
    %c0_3 = arith.constant 0 : index
    %c1 = arith.constant 1 : index
    %c0_4 = arith.constant 0 : index
    %c0_5 = arith.constant 0 : index
    %3 = vector.load %arg1[%c0_3, %c1, %c0_4, %c0_5] : memref<8x2x8x128xf32, #tpu.memory_space<vmem>>, vector<8x1x8x128xf32>
    %4 = vector.shape_cast %3 : vector<8x1x8x128xf32> to vector<8x8x128xf32>
    %5 = vector.shape_cast %4 : vector<8x8x128xf32> to vector<64x128xf32>
    %cst = arith.constant dense<0.000000e+00> : vector<64xf32>
    %6 = vector.multi_reduction <add>, %2, %cst [1] : vector<64x128xf32> to vector<64xf32>
    %7 = vector.shape_cast %6 : vector<64xf32> to vector<64x1xf32>
    %cst_6 = arith.constant dense<0.000000e+00> : vector<64xf32>
    %8 = vector.multi_reduction <add>, %5, %cst_6 [1] : vector<64x128xf32> to vector<64xf32>
    %9 = vector.shape_cast %8 : vector<64xf32> to vector<64x1xf32>
    %10 = arith.addf %7, %9 : vector<64x1xf32>
    %11 = arith.mulf %2, %2 : vector<64x128xf32>
    %cst_7 = arith.constant dense<0.000000e+00> : vector<64xf32>
    %12 = vector.multi_reduction <add>, %11, %cst_7 [1] : vector<64x128xf32> to vector<64xf32>
    %13 = vector.shape_cast %12 : vector<64xf32> to vector<64x1xf32>
    %14 = arith.mulf %5, %5 : vector<64x128xf32>
    %cst_8 = arith.constant dense<0.000000e+00> : vector<64xf32>
    %15 = vector.multi_reduction <add>, %14, %cst_8 [1] : vector<64x128xf32> to vector<64xf32>
    %16 = vector.shape_cast %15 : vector<64xf32> to vector<64x1xf32>
    %17 = arith.addf %13, %16 : vector<64x1xf32>
    %cst_9 = arith.constant 3.906250e-03 : f32
    %18 = vector.broadcast %cst_9 : f32 to vector<64x1xf32>
    %19 = arith.mulf %10, %18 : vector<64x1xf32>
    %cst_10 = arith.constant 3.906250e-03 : f32
    %20 = vector.broadcast %cst_10 : f32 to vector<64x1xf32>
    %21 = arith.mulf %17, %20 : vector<64x1xf32>
    %22 = arith.mulf %19, %19 : vector<64x1xf32>
    %23 = arith.subf %21, %22 : vector<64x1xf32>
    %cst_11 = arith.constant 9.99999974E-6 : f32
    %24 = vector.broadcast %cst_11 : f32 to vector<64x1xf32>
    %25 = arith.addf %23, %24 : vector<64x1xf32>
    %26 = math.rsqrt %25 : vector<64x1xf32>
    %27 = vector.broadcast %19 : vector<64x1xf32> to vector<64x128xf32>
    %28 = arith.subf %2, %27 : vector<64x128xf32>
    %29 = vector.broadcast %26 : vector<64x1xf32> to vector<64x128xf32>
    %30 = arith.mulf %28, %29 : vector<64x128xf32>
    %31 = vector.broadcast %19 : vector<64x1xf32> to vector<64x128xf32>
    %32 = arith.subf %5, %31 : vector<64x128xf32>
    %33 = vector.broadcast %26 : vector<64x1xf32> to vector<64x128xf32>
    %34 = arith.mulf %32, %33 : vector<64x128xf32>
    %c0_12 = arith.constant 0 : index
    %c0_13 = arith.constant 0 : index
    %35 = vector.load %arg2[%c0_12, %c0_13] : memref<256x128xf32, #tpu.memory_space<vmem>>, vector<128x128xf32>
    %cst_14 = arith.constant dense<0.000000e+00> : vector<64x128xf32>
    %36 = tpu.matmul %30, %35, %cst_14 {dimension_numbers = #tpu.dot_dimension_numbers<[1], [0], [0], [1], [0, 0, 1, 1], [], []>} : vector<64x128xf32>, vector<128x128xf32>, vector<64x128xf32> -> vector<64x128xf32>
    %c128 = arith.constant 128 : index
    %c0_15 = arith.constant 0 : index
    %37 = vector.load %arg2[%c128, %c0_15] : memref<256x128xf32, #tpu.memory_space<vmem>>, vector<128x128xf32>
    %cst_16 = arith.constant dense<0.000000e+00> : vector<64x128xf32>
    %38 = tpu.matmul %34, %37, %cst_16 {dimension_numbers = #tpu.dot_dimension_numbers<[1], [0], [0], [1], [0, 0, 1, 1], [], []>} : vector<64x128xf32>, vector<128x128xf32>, vector<64x128xf32> -> vector<64x128xf32>
    %39 = arith.addf %36, %38 : vector<64x128xf32>
    %c0_17 = arith.constant 0 : index
    %c0_18 = arith.constant 0 : index
    %40 = vector.load %arg3[%c0_17, %c0_18] : memref<1x128xf32, #tpu.memory_space<vmem>>, vector<1x128xf32>
    %41 = vector.broadcast %40 : vector<1x128xf32> to vector<64x128xf32>
    %42 = arith.addf %39, %41 : vector<64x128xf32>
    %c0_19 = arith.constant 0 : index
    %c0_20 = arith.constant 0 : index
    %43 = vector.load %arg4[%c0_19, %c0_20] : memref<64x128xf32, #tpu.memory_space<vmem>>, vector<64x128xf32>
    tpu.vector_store %arg4[%c0_19, %c0_20], %42 {strides = array<i32>} : memref<64x128xf32, #tpu.memory_space<vmem>>, vector<64x128xf32>,
    return
  }
  func.func @transform_0(%arg0: i32) -> (i32, i32, i32, i32) {
    %c0_i32 = arith.constant 0 : i32
    %c0_i32_0 = arith.constant 0 : i32
    %c0_i32_1 = arith.constant 0 : i32
    %c0_i32_2 = arith.constant 0 : i32
    return %arg0, %c0_i32, %c0_i32_0, %c0_i32_1 : i32, i32, i32, i32
  }
  func.func @transform_1(%arg0: i32) -> (i32, i32) {
    %c0_i32 = arith.constant 0 : i32
    %c0_i32_0 = arith.constant 0 : i32
    %c0_i32_1 = arith.constant 0 : i32
    return %c0_i32, %c0_i32_0 : i32, i32
  }
  func.func @transform_2(%arg0: i32) -> (i32, i32) {
    %c0_i32 = arith.constant 0 : i32
    %c0_i32_0 = arith.constant 0 : i32
    %c0_i32_1 = arith.constant 0 : i32
    return %c0_i32, %c0_i32_0 : i32, i32
  }
  func.func @transform_3(%arg0: i32) -> (i32, i32) {
    %c0_i32 = arith.constant 0 : i32
    %c0_i32_0 = arith.constant 0 : i32
    return %arg0, %c0_i32 : i32, i32
  }
}

</mosaic_0001>

<bundles_post_ra>
// kernel: tpu_custom_call.1
= control target key start
LH: loop header
LB: loop body
LE: loop exit
PB: predicated region body
PF: predicated region fallthrough
CT: control target
= control target key end

     0   :  { %8 = vsyncpa [#allocation3], 0  ;;  %s1479_s0 = inlined_call_operand.hbm [shape: f32[16,2,8,128], index: 0, kind: input, shape index: {}]   ;;  %s1480_s1 = inlined_call_operand.hbm [shape: f32[256,128], index: 1, kind: input, shape index: {}]   ;;  %s1481_s2 = inlined_call_operand.vmem [shape: f32[1,128], index: 2, kind: input, shape index: {}]   ;;  %s1482_s3 = inlined_call_operand.hbm [shape: f32[128,128], index: 3, kind: output, shape index: {}]  }
   0x1   :  { %10 = vsyncpa [#allocation3 + $0x1], 0 }
   0x2   :  { %11 = vsyncpa [#allocation6], 0 }
   0x3   :  { %12 = vsyncpa [#allocation4], 0 }
   0x4   :  { %14 = vsyncpa [#allocation4 + $0x1], 0  ;;  %s1155_s12 = smov 0   ;;  %s1157_s13 = smov 0  }
   0x5   :  { %s1159_s14 = smov 0   ;;  %s1161_s15 = smov 0  }
   0x6 LB: > { %s1176_s16 = sadd.s32 4294967295, %s1126_s15   ;;  %s762_s17 = sadd.s32 4294967294, %s1126_s15   ;;  %s1126_s15 = sphi %s1161_s15, %s1504_s15   ;;  %s1122_s14 = sphi %s1159_s14, %s1503_s14   ;;  %s1118_s13 = sphi %s1157_s13, %s1502_s13   ;;  %s1114_s12 = sphi %s1155_s12, %s1501_s12  }
   0x7   : > { %p40_p0 = scmp.ne.s32.totalorder %s1118_s13, %s1114_s12  ;;  %p1483_p1 = scmp.eq.s32.totalorder %s1176_s16, 0 }
   0x8   : > { %p112_p3 = scmp.eq.s32.totalorder %s762_s17, 1  ;;  %p763_p5 = scmp.ge.s32.totalorder %s1126_s15, 1 }
   0x9   : > { %p1185_p4 = por %p1483_p1, %p40_p0  ;;  %p119_p7 = scmp.lt.s32.totalorder %s1126_s15, 3 }
   0xa   : > { %p1190_p6 = por %p112_p3, %p40_p0  ;;  %s1128_s21 = smov [#allocation5]  }
   0xb   : > { %s1487_s18 = scalar_select %p1185_p4, 1, 0 }
   0xc   : > { %s1488_s19 = scalar_select %p1190_p6, 1, 0 }
   0xd   : > { %p1195_p8 = pnand %p763_p5, %p119_p7  ;;  %s131_s22 = sshll.u32 %s1128_s21, 4  ;;  %s132_s22 = int_to_ptr.vmem [resolvable:$true] %s131_s22 }
   0xe   : > { %s1209_s24 = sadd.s32 1, %s1126_s15   ;;  %s27_s25 = sadd.s32 1, %s1122_s14 }
   0xf   : > { %s1489_s20 = scalar_select %p1195_p8, 1, 0 }
  0x10   : > { %p935_p9 = pneg %p1195_p8  ;;  %s24_s26 = ssub.s32 %s1126_s15, %s1209_s24 }
  0x11   : > { %s1015_s27 = scalar_lea.vmem %s132_s22, 4096  ;;  %p1023_p5 = scmp.lt.s32.totalorder %s132_s22, %s132_s22 }
  0x12   : > { %p1204_p11 = pnand %p935_p9, %p1483_p1  ;;  %p1016_p13 = scmp.ne.s32.totalorder %s132_s22, %s1015_s27 }
  0x13   : > { %p1024_p7 = scmp.lt.s32.totalorder %s1015_s27, %s1015_s27 }
  0x14   : > { %p1006_p12 = pneg %p1204_p11 }
  0x15   : > { %p1025_p10 = por %p1024_p7, %p1023_p5 }
  0x16   : > { %p1018_p0 = pnand %p1016_p13, %p1006_p12 }
  0x18   : > { %p1019_p3 = pneg %p1018_p0 }
  0x1a   : > { %p1026_p2 = pnand %p1025_p10, %p1019_p3 }
  0x1c   : > { %1029 = shalt.err (!%p1026_p2)
}
  0x1d   : > { %s1129_s28 = smov 128   ;;  %s1130_s29 = smov 8  }
  0x1e   : > { %938 = dma.hbm_to_vmem [thread:$0]  (!%p1204_p11), %s1480_s1, 4096, %s132_s22, [#allocation6], %s1129_s28, %s1129_s28, %s1130_s29  }
  0x1f   : > { %p25_p2 = scmp.eq.s32.totalorder %s24_s26, 0  ;;  %p34_p9 = scmp.ne.s32.totalorder %s1122_s14, %s1118_s13 }
  0x20   : > { %p35_p10 = scmp.eq.s32.totalorder %s1126_s15, 0  ;;  %p948_p12 = scmp.lt.s32.totalorder %s1126_s15, 2 }
  0x21   : > { %s1229_s5 = scalar_select %p25_p2, %s1122_s14, %s27_s25  }
  0x22   : > { %p36_p13 = por %p35_p10, %p34_p9  ;;  %p1491_p0 = scmp.eq.s32.totalorder %s1176_s16, 1 }
  0x23   : > { %s148_s7 = sand.u32 1, %s1122_s14   ;;  %s789_s8 = sshll.u32 %s1126_s15, 11 }
  0x24   : > { %p1233_p3 = por %p1491_p0, %p34_p9  ;;  %s766_s9 = sshll.u32 %s148_s7, 7 }
  0x25   : > { %s1242_s17 = scalar_lea.hbm %s1479_s0, %s789_s8  ;;  %s152_s21 = scalar_lea.vmem [#allocation2], %s766_s9 }
  0x26   : > { %s1492_s6 = scalar_select %p1233_p3, 1, 0 }
  0x27   : > { %s160_s22 = sshll.u32 %s152_s21, 4  ;;  %p1244_p11 = pnand %p948_p12, %p36_p13  ;;  %s1248_s22 = int_to_ptr.vmem [resolvable:$true] %s160_s22 }
  0x28   : > { %s1250_s25 = scalar_lea.sflag [#allocation3], %s148_s7  ;;  %s1030_s26 = scalar_lea.hbm %s1242_s17, 2048 }
  0x29   : > { %p1031_p5 = scmp.ne.s32.totalorder %s1242_s17, %s1030_s26  ;;  %p1032_p7 = pneg %p1244_p11 }
  0x2a   : > { %s1035_s4 = scalar_lea.hbm %s1479_s0, 4096  ;;  %p1036_p10 = scmp.lt.s32.totalorder %s1242_s17, %s1479_s0 }
  0x2b   : > { %p1033_p2 = pnand %p1032_p7, %p1031_p5  ;;  %p1037_p12 = scmp.lt.s32.totalorder %s1035_s4, %s1030_s26 }
  0x2d   : > { %p1034_p9 = pneg %p1033_p2  ;;  %p1038_p13 = por %p1037_p12, %p1036_p10 }
  0x2f   : > { %p1039_p0 = pnand %p1038_p13, %p1034_p9 }
  0x31   : > { %1042 = shalt.err (!%p1039_p0)
}
  0x32   : > { %s1043_s7 = scalar_lea.vmem %s1248_s22, 2048  ;;  %s1131_s10 = smov [#allocation2]  }
  0x33   : > { %p1044_p1 = scmp.ne.s32.totalorder %s1248_s22, %s1043_s7  ;;  %s1048_s11 = sshll.u32 %s1131_s10, 4  ;;  %s1049_s11 = int_to_ptr.vmem [resolvable:$false] %s1048_s11 }
  0x34   : > { %s1050_s21 = scalar_lea.vmem %s1049_s11, 4096  ;;  %p1051_p2 = scmp.lt.s32.totalorder %s1248_s22, %s1049_s11 }
  0x35   : > { %p1046_p6 = pnand %p1044_p1, %p1032_p7  ;;  %p1052_p3 = scmp.lt.s32.totalorder %s1050_s21, %s1043_s7 }
  0x37   : > { %p1047_p5 = pneg %p1046_p6  ;;  %p1053_p4 = por %p1052_p3, %p1051_p2 }
  0x39   : > { %p1054_p8 = pnand %p1053_p4, %p1047_p5 }
  0x3b   : > { %1057 = shalt.err (!%p1054_p8)
}
  0x3c   : > { %942 = dma.hbm_to_vmem [thread:$0]  (!%p1244_p11), %s1242_s17, 2048, %s1248_s22, %s1250_s25, %s1129_s28, %s1129_s28, %s1130_s29  }
  0x3d   : > { %p1494_p1 = scmp.ne.s32.totalorder %s1489_s20, 0 }
  0x3e   : > { %s1277_s26 = sand.u32 (!%p1494_p1), 1, %s1118_s13   ;;  %p1495_p4 = scmp.ne.s32.totalorder (!%p1494_p1), %s1487_s18, 0 }
  0x3f   : > { %172 = sbr.rel (%p1494_p1) target bundleno = 508 (0x1fc), region = 32  ;;  %s771_s27 = sshll.u32 (!%p1494_p1), %s1277_s26, 7 }
  0x40   : > { %s175_s30 = scalar_lea.sflag (!%p1494_p1), [#allocation3], %s1277_s26  ;;  %s1281_s4 = scalar_lea.vmem (!%p1494_p1), [#allocation2], %s771_s27 }
  0x44   : > { %1101 = dma.done.wait (%p1495_p4), %s175_s30, 2048  }
  0x45   : > { %1103 = vsyncadd (%p1495_p4), %s175_s30, 4294965248  ;;  %p1496_p6 = scmp.eq.s32.totalorder %s1176_s16, 0 }
  0x47   : > { %1105 = dma.done.wait (%p1496_p6), [#allocation6], 4096   ;;  %p1497_p8 = pmov %p1496_p6 }
  0x48   : > { %v1292_v0 = vld [vmem:[%s1281_s4 + $0x10] sm:$0xff]  ;;  %v1295_v1 = vld [vmem:[%s1281_s4] sm:$0xff]  ;;  %v1300_v2 = vld [vmem:[%s1281_s4 + $0x18] sm:$0xff]  ;;  %s773_s18 = sshll.u32 %s1277_s26, 6  ;;  %s790_s22 = sshll.u32 %s1176_s16, 10 }
  0x49   : > { %1107 = vsyncadd (%p1497_p8), [#allocation6], 4294963200  ;;  %226 = vadd.xlane.f32.xlu1 %v1292_v0  ;;  %224 = vadd.xlane.f32.xlu0 %v1295_v1  ;;  %v1303_v3 = vld [vmem:[%s1281_s4 + $0x8] sm:$0xff]  ;;  %v264_v5 = vmul.f32 %v1295_v1, %v1295_v1  ;;  %v289_v6 = vmul.f32 %v1300_v2, %v1300_v2  ;;  %v265_v7 = vmul.f32 %v1292_v0, %v1292_v0  ;;  %v1319_v9 = vld [vmem:[%s1281_s4 + $0x20] sm:$0xff]  ;;  %s1419_s29 = scalar_lea.vmem [#allocation7], %s773_s18  ;;  %s1434_s8 = scalar_lea.hbm %s1482_s3, %s790_s22 }
  0x4a   : > { %v288_v4 = vmul.f32 %v1303_v3, %v1303_v3  ;;  %v1316_v8 = vld [vmem:[%s1281_s4 + $0x28] sm:$0xff]  ;;  %v431_v10 = vld [vmem:[#allocation5 + $0xf8] sm:$0xff]  ;;  %v430_v12 = vld [vmem:[#allocation5 + $0xf0] sm:$0xff]  ;;  %v266_v21 = vmul.f32 %v1319_v9, %v1319_v9  ;;  %s679_s17 = sshll.u32 %s1419_s29, 4  ;;  %s666_s9 = scalar_lea.sflag [#allocation4], %s1277_s26  ;;  %s1429_s17 = int_to_ptr.vmem [resolvable:$true] %s679_s17 }
  0x4b   : > { %v415_v11 = vld [vmem:[#allocation5 + $0x78] sm:$0xff]  ;;  %839 = vmatprep.subr.mxu0 %v431_v10  ;;  %v414_v13 = vld [vmem:[#allocation5 + $0x70] sm:$0xff]  ;;  %v429_v16 = vld [vmem:[#allocation5 + $0xe8] sm:$0xff]  ;;  %v290_v20 = vmul.f32 %v1316_v8, %v1316_v8  ;;  %s1058_s7 = scalar_lea.vmem %s1429_s17, 1024  ;;  %p1498_p11 = scmp.ne.s32.totalorder %s1492_s6, 0 }
  0x4c   : > { %883 = vmatprep.subr.mxu1 %v415_v11  ;;  %840 = vmatpush3.msra.mxu0 %v431_v10  ;;  %v1324_v14 = vld [vmem:[%s1281_s4 + $0x38] sm:$0xff]  ;;  %v1327_v15 = vld [vmem:[%s1281_s4 + $0x30] sm:$0xff]  ;;  %v413_v17 = vld [vmem:[#allocation5 + $0x68] sm:$0xff]  ;;  %p1059_p3 = scmp.ne.s32.totalorder %s1429_s17, %s1058_s7  ;;  %s1132_s16 = smov [#allocation7]  }
  0x4d   : > { %242 = vadd.xlane.f32.xlu1 %v1300_v2  ;;  %240 = vadd.xlane.f32.xlu0 %v1303_v3  ;;  %v428_v18 = vld [vmem:[#allocation5 + $0xe0] sm:$0xff]  ;;  %v427_v22 = vld [vmem:[#allocation5 + $0xd8] sm:$0xff]  ;;  %v291_v24 = vmul.f32 %v1324_v14, %v1324_v14  ;;  %v267_v25 = vmul.f32 %v1327_v15, %v1327_v15  ;;  %v426_v26 = vld [vmem:[#allocation5 + $0xd0] sm:$0xff]  ;;  %s1062_s10 = sshll.u32 %s1132_s16, 4  ;;  %s1063_s10 = int_to_ptr.vmem [resolvable:$false] %s1062_s10 }
  0x4e   : > { %884 = vmatpush3.msra.mxu1 %v415_v11  ;;  %841 = vmatprep.subr.mxu0 %v430_v12  ;;  %v412_v19 = vld [vmem:[#allocation5 + $0x60] sm:$0xff]  ;;  %v411_v23 = vld [vmem:[#allocation5 + $0x58] sm:$0xff]  ;;  %v410_v27 = vld [vmem:[#allocation5 + $0x50] sm:$0xff]  ;;  %p1060_p7 = pnand %p1059_p3, %p1498_p11  ;;  %s1064_s11 = scalar_lea.vmem %s1063_s10, 2048 }
  0x4f   : > { %885 = vmatprep.subr.mxu1 %v414_v13  ;;  %842 = vmatpush3.msra.mxu0 %v430_v12  ;;  %v425_v28 = vld [vmem:[#allocation5 + $0xc8] sm:$0xff]  ;;  %v1343_v31 = vld [vmem:[%s1281_s4 + $0x40] sm:$0xff]  ;;  %v423_v34 = vld [vmem:[#allocation5 + $0xb8] sm:$0xff]  ;;  %p1065_p10 = scmp.lt.s32.totalorder %s1429_s17, %s1063_s10  ;;  %p1066_p12 = scmp.lt.s32.totalorder %s1064_s11, %s1058_s7 }
  0x50   : > { %886 = vmatpush3.msra.mxu1 %v414_v13  ;;  %843 = vmatprep.subr.mxu0 %v429_v16  ;;  %v409_v29 = vld [vmem:[#allocation5 + $0x48] sm:$0xff]  ;;  %v424_v32 = vld [vmem:[#allocation5 + $0xc0] sm:$0xff]  ;;  %v407_v35 = vld [vmem:[#allocation5 + $0x38] sm:$0xff]  ;;  %v268_v41 = vmul.f32 %v1343_v31, %v1343_v31  ;;  %p1061_p9 = pneg %p1060_p7 }
  0x51   : > { %296 = vadd.xlane.f32.xlu1 %v288_v4  ;;  %272 = vadd.xlane.f32.xlu0 %v264_v5  ;;  %v1340_v30 = vld [vmem:[%s1281_s4 + $0x48] sm:$0xff]  ;;  %v408_v33 = vld [vmem:[#allocation5 + $0x40] sm:$0xff]  ;;  %v1348_v36 = vld [vmem:[%s1281_s4 + $0x58] sm:$0xff]  ;;  %p1067_p13 = por %p1066_p12, %p1065_p10 }
  0x52   : > { %887 = vmatprep.subr.mxu1 %v413_v17  ;;  %844 = vmatpush3.msra.mxu0 %v429_v16  ;;  %v1351_v37 = vld [vmem:[%s1281_s4 + $0x50] sm:$0xff]  ;;  %v292_v40 = vmul.f32 %v1340_v30, %v1340_v30  ;;  %v421_v42 = vld [vmem:[#allocation5 + $0xa8] sm:$0xff]  ;;  %v293_v44 = vmul.f32 %v1348_v36, %v1348_v36  ;;  %v420_v46 = vld [vmem:[#allocation5 + $0xa0] sm:$0xff] }
  0x53   : > { %888 = vmatpush3.msra.mxu1 %v413_v17  ;;  %845 = vmatprep.subr.mxu0 %v428_v18  ;;  %v422_v38 = vld [vmem:[#allocation5 + $0xb0] sm:$0xff]  ;;  %v405_v43 = vld [vmem:[#allocation5 + $0x28] sm:$0xff]  ;;  %v269_v45 = vmul.f32 %v1351_v37, %v1351_v37  ;;  %v404_v47 = vld [vmem:[#allocation5 + $0x20] sm:$0xff]  ;;  %p1068_p0 = pnand %p1067_p13, %p1061_p9 }
  0x54   : > { %889 = vmatprep.subr.mxu1 %v412_v19  ;;  %846 = vmatpush3.msra.mxu0 %v428_v18  ;;  %v406_v39 = vld [vmem:[#allocation5 + $0x30] sm:$0xff]  ;;  %v419_v48 = vld [vmem:[#allocation5 + $0x98] sm:$0xff]  ;;  %v1364_v50 = vld [vmem:[%s1281_s4 + $0x68] sm:$0xff] }
  0x55   : > { %298 = vadd.xlane.f32.xlu1 %v289_v6  ;;  %274 = vadd.xlane.f32.xlu0 %v265_v7  ;;  %v403_v49 = vld [vmem:[#allocation5 + $0x18] sm:$0xff]  ;;  %v1367_v51 = vld [vmem:[%s1281_s4 + $0x60] sm:$0xff]  ;;  %v418_v52 = vld [vmem:[#allocation5 + $0x90] sm:$0xff]  ;;  %v294_v60 = vmul.f32 %v1364_v50, %v1364_v50 }
  0x56   : > { %890 = vmatpush3.msra.mxu1 %v412_v19  ;;  %847 = vmatprep.subr.mxu0 %v427_v22  ;;  %v402_v53 = vld [vmem:[#allocation5 + $0x10] sm:$0xff]  ;;  %v417_v54 = vld [vmem:[#allocation5 + $0x88] sm:$0xff]  ;;  %v1372_v56 = vld [vmem:[%s1281_s4 + $0x78] sm:$0xff]  ;;  %v270_v61 = vmul.f32 %v1367_v51, %v1367_v51 }
  0x57   : > { %891 = vmatprep.subr.mxu1 %v411_v23  ;;  %848 = vmatpush3.msra.mxu0 %v427_v22  ;;  %v401_v55 = vld [vmem:[#allocation5 + $0x8] sm:$0xff]  ;;  %v1375_v57 = vld [vmem:[%s1281_s4 + $0x70] sm:$0xff]  ;;  %v416_v58 = vld [vmem:[#allocation5 + $0x80] sm:$0xff]  ;;  %v295_v62 = vmul.f32 %v1372_v56, %v1372_v56 }
  0x58   : > { %892 = vmatpush3.msra.mxu1 %v411_v23  ;;  %849 = vmatprep.subr.mxu0 %v426_v26  ;;  %v400_v59 = vld [vmem:[#allocation5] sm:$0xff]  ;;  %v271_v63 = vmul.f32 %v1375_v57, %v1375_v57 }
  0x59   : > { %244 = vadd.xlane.f32.xlu1 %v1316_v8  ;;  %228 = vadd.xlane.f32.xlu0 %v1319_v9 }
  0x5a   : > { %893 = vmatprep.subr.mxu1 %v410_v27  ;;  %850 = vmatpush3.msra.mxu0 %v426_v26 }
  0x5b   : > { %894 = vmatpush3.msra.mxu1 %v410_v27  ;;  %851 = vmatprep.subr.mxu0 %v425_v28 }
  0x5c   : > { %895 = vmatprep.subr.mxu1 %v409_v29  ;;  %852 = vmatpush3.msra.mxu0 %v425_v28 }
  0x5d   : > { %246 = vadd.xlane.f32.xlu1 %v1324_v14  ;;  %230 = vadd.xlane.f32.xlu0 %v1327_v15 }
  0x5e   : > { %896 = vmatpush3.msra.mxu1 %v409_v29  ;;  %853 = vmatprep.subr.mxu0 %v424_v32 }
  0x5f   : > { %897 = vmatprep.subr.mxu1 %v408_v33  ;;  %854 = vmatpush3.msra.mxu0 %v424_v32 }
  0x60   : > { %898 = vmatpush3.msra.mxu1 %v408_v33  ;;  %855 = vmatprep.subr.mxu0 %v423_v34 }
  0x61   : > { %300 = vadd.xlane.f32.xlu1 %v290_v20  ;;  %276 = vadd.xlane.f32.xlu0 %v266_v21 }
  0x62   : > { %899 = vmatprep.subr.mxu1 %v407_v35  ;;  %856 = vmatpush3.msra.mxu0 %v423_v34 }
  0x63   : > { %900 = vmatpush3.msra.mxu1 %v407_v35  ;;  %857 = vmatprep.subr.mxu0 %v422_v38 }
  0x64   : > { %901 = vmatprep.subr.mxu1 %v406_v39  ;;  %858 = vmatpush3.msra.mxu0 %v422_v38 }
  0x65   : > { %302 = vadd.xlane.f32.xlu1 %v291_v24  ;;  %278 = vadd.xlane.f32.xlu0 %v267_v25 }
  0x66   : > { %902 = vmatpush3.msra.mxu1 %v406_v39  ;;  %859 = vmatprep.subr.mxu0 %v421_v42 }
  0x67   : > { %903 = vmatprep.subr.mxu1 %v405_v43  ;;  %860 = vmatpush3.msra.mxu0 %v421_v42 }
  0x68   : > { %904 = vmatpush3.msra.mxu1 %v405_v43  ;;  %861 = vmatprep.subr.mxu0 %v420_v46 }
  0x69   : > { %248 = vadd.xlane.f32.xlu1 %v1340_v30  ;;  %232 = vadd.xlane.f32.xlu0 %v1343_v31 }
  0x6a   : > { %905 = vmatprep.subr.mxu1 %v404_v47  ;;  %862 = vmatpush3.msra.mxu0 %v420_v46 }
  0x6b   : > { %906 = vmatpush3.msra.mxu1 %v404_v47  ;;  %863 = vmatprep.subr.mxu0 %v419_v48 }
  0x6c   : > { %907 = vmatprep.subr.mxu1 %v403_v49  ;;  %864 = vmatpush3.msra.mxu0 %v419_v48 }
  0x6d   : > { %250 = vadd.xlane.f32.xlu1 %v1348_v36  ;;  %234 = vadd.xlane.f32.xlu0 %v1351_v37 }
  0x6e   : > { %908 = vmatpush3.msra.mxu1 %v403_v49  ;;  %865 = vmatprep.subr.mxu0 %v418_v52 }
  0x6f   : > { %909 = vmatprep.subr.mxu1 %v402_v53  ;;  %866 = vmatpush3.msra.mxu0 %v418_v52 }
  0x70   : > { %910 = vmatpush3.msra.mxu1 %v402_v53  ;;  %867 = vmatprep.subr.mxu0 %v417_v54 }
  0x71   : > { %304 = vadd.xlane.f32.xlu1 %v292_v40  ;;  %280 = vadd.xlane.f32.xlu0 %v268_v41 }
  0x72   : > { %911 = vmatprep.subr.mxu1 %v401_v55  ;;  %868 = vmatpush3.msra.mxu0 %v417_v54 }
  0x73   : > { %912 = vmatpush3.msra.mxu1 %v401_v55  ;;  %869 = vmatprep.subr.mxu0 %v416_v58 }
  0x74   : > { %913 = vmatprep.subr.mxu1 %v400_v59  ;;  %870 = vmatpush3.msra.mxu0 %v416_v58 }
  0x75   : > { %306 = vadd.xlane.f32.xlu1 %v293_v44  ;;  %282 = vadd.xlane.f32.xlu0 %v269_v45 }
  0x76   : > { %914 = vmatpush3.msra.mxu1 %v400_v59 }
  0x79   : > { %252 = vadd.xlane.f32.xlu1 %v1364_v50  ;;  %236 = vadd.xlane.f32.xlu0 %v1367_v51 }
  0x7d   : > { %254 = vadd.xlane.f32.xlu1 %v1372_v56  ;;  %238 = vadd.xlane.f32.xlu0 %v1375_v57 }
  0x81   : > { %308 = vadd.xlane.f32.xlu1 %v294_v60  ;;  %284 = vadd.xlane.f32.xlu0 %v270_v61 }
  0x85   : > { %310 = vadd.xlane.f32.xlu1 %v295_v62  ;;  %286 = vadd.xlane.f32.xlu0 %v271_v63 }
  0xd2   : > { %v227_v4 = vpop.xlane.xlu1 %226  ;;  %v225_v5 = vpop.xlane.xlu0 %224 }
  0xd6   : > { %v243_v6 = vpop.xlane.xlu1 %242  ;;  %v241_v7 = vpop.xlane.xlu0 %240 }
  0xd7   : > { %v256_v10 = vadd.f32 %v241_v7, %v225_v5  ;;  %v257_v11 = vadd.f32 %v243_v6, %v227_v4 }
  0xd9   : > { %v320_v12 = vmul.f32 0.00390625, %v256_v10  ;;  %v321_v18 = vmul.f32 0.00390625, %v257_v11 }
  0xda   : > { %v297_v13 = vpop.xlane.xlu1 %296  ;;  %v273_v16 = vpop.xlane.xlu0 %272 }
  0xdb   : > { %v312_v17 = vadd.f32 %v297_v13, %v273_v16  ;;  %v336_v19 = vmul.f32 %v320_v12, %v320_v12  ;;  %v337_v26 = vmul.f32 %v321_v18, %v321_v18  ;;  %v384_v53 = vsub.f32 %v1303_v3, %v320_v12 }
  0xdc   : > { %v368_v54 = vsub.f32 %v1295_v1, %v320_v12  ;;  %v369_v5 = vsub.f32 %v1292_v0, %v321_v18  ;;  %v385_v6 = vsub.f32 %v1300_v2, %v321_v18 }
  0xdd   : > { %v328_v20 = vmul.f32 0.00390625, %v312_v17 }
  0xde   : > { %v299_v21 = vpop.xlane.xlu1 %298  ;;  %v275_v22 = vpop.xlane.xlu0 %274 }
  0xdf   : > { %v344_v23 = vsub.f32 %v328_v20, %v336_v19  ;;  %v313_v24 = vadd.f32 %v299_v21, %v275_v22 }
  0xe1   : > { %v352_v25 = vadd.f32 1e-05, %v344_v23  ;;  %v329_v27 = vmul.f32 0.00390625, %v313_v24 }
  0xe2   : > { %v245_v28 = vpop.xlane.xlu1 %244  ;;  %v229_v29 = vpop.xlane.xlu0 %228 }
  0xe3   : > { %988 = vrsqrt.f32 %v352_v25  ;;  %v345_v32 = vsub.f32 %v329_v27, %v337_v26  ;;  %v258_v34 = vadd.f32 %v245_v28, %v229_v29 }
  0xe5   : > { %v353_v33 = vadd.f32 1e-05, %v345_v32  ;;  %v322_v40 = vmul.f32 0.00390625, %v258_v34 }
  0xe6   : > { %v247_v35 = vpop.xlane.xlu1 %246  ;;  %v231_v38 = vpop.xlane.xlu0 %230 }
  0xe7   : > { %990 = vrsqrt.f32 %v353_v33  ;;  %v259_v39 = vadd.f32 %v247_v35, %v231_v38  ;;  %v338_v45 = vmul.f32 %v322_v40, %v322_v40  ;;  %v370_v25 = vsub.f32 %v1319_v9, %v322_v40 }
  0xe8   : > { %v386_v26 = vsub.f32 %v1316_v8, %v322_v40 }
  0xe9   : > { %v1387_v44 = vmul.f32 0.00390625, %v259_v39 }
  0xea   : > { %v301_v41 = vpop.xlane.xlu1 %300  ;;  %v277_v42 = vpop.xlane.xlu0 %276 }
  0xeb   : > { %v314_v43 = vadd.f32 %v301_v41, %v277_v42  ;;  %v339_v58 = vmul.f32 %v1387_v44, %v1387_v44  ;;  %v371_v42 = vsub.f32 %v1327_v15, %v1387_v44  ;;  %v387_v9 = vsub.f32 %v1324_v14, %v1387_v44 }
  0xed   : > { %v330_v46 = vmul.f32 0.00390625, %v314_v43 }
  0xee   : > { %v303_v47 = vpop.xlane.xlu1 %302  ;;  %v279_v48 = vpop.xlane.xlu0 %278 }
  0xef   : > { %v346_v49 = vsub.f32 %v330_v46, %v338_v45  ;;  %v315_v52 = vadd.f32 %v303_v47, %v279_v48 }
  0xf0   : > { %v989_v55 = vpop.eup %988 }
  0xf1   : > { %v354_v59 = vadd.f32 1e-05, %v346_v49  ;;  %v331_v60 = vmul.f32 0.00390625, %v315_v52  ;;  %v392_v61 = vmul.f32 %v989_v55, %v384_v53  ;;  %v376_v62 = vmul.f32 %v989_v55, %v368_v54 }
  0xf2   : > { %v249_v63 = vpop.xlane.xlu1 %248  ;;  %v233_v4 = vpop.xlane.xlu0 %232 }
  0xf3   : > { %992 = vrsqrt.f32 %v354_v59  ;;  %v347_v7 = vsub.f32 %v331_v60, %v339_v58  ;;  %871 = vmatprep.mubr.f32.mxu0 %v392_v61  ;;  %915 = vmatprep.mubr.f32.mxu1 %v376_v62  ;;  %v260_v10 = vadd.f32 %v249_v63, %v233_v4 }
  0xf4   : > { %v991_v3 = vpop.eup %990 }
  0xf5   : > { %v355_v1 = vadd.f32 1e-05, %v347_v7  ;;  %v393_v11 = vmul.f32 %v991_v3, %v385_v6  ;;  %v377_v12 = vmul.f32 %v991_v3, %v369_v5  ;;  %v324_v19 = vmul.f32 0.00390625, %v260_v10 }
  0xf6   : > { %v251_v13 = vpop.xlane.xlu1 %250  ;;  %v235_v16 = vpop.xlane.xlu0 %234 }
  0xf7   : > { %994 = vrsqrt.f32 %v355_v1  ;;  %872 = vmatmul.mubr.f32.vlgmr.msra.gmra.mxu0 %v393_v11  ;;  %916 = vmatmul.mubr.f32.vlgmr.msra.gmra.mxu1 %v377_v12  ;;  %v261_v17 = vadd.f32 %v251_v13, %v235_v16  ;;  %v340_v18 = vmul.f32 %v324_v19, %v324_v19  ;;  %v372_v61 = vsub.f32 %v1343_v31, %v324_v19 }
  0xf8   : > { %v388_v62 = vsub.f32 %v1340_v30, %v324_v19 }
  0xf9   : > { %v1395_v2 = vmul.f32 0.00390625, %v261_v17 }
  0xfa   : > { %v305_v20 = vpop.xlane.xlu1 %304  ;;  %v281_v0 = vpop.xlane.xlu0 %280 }
  0xfb   : > { %v316_v21 = vadd.f32 %v305_v20, %v281_v0  ;;  %v341_v32 = vmul.f32 %v1395_v2, %v1395_v2  ;;  %v373_v11 = vsub.f32 %v1351_v37, %v1395_v2  ;;  %v389_v12 = vsub.f32 %v1348_v36, %v1395_v2 }
  0xfd   : > { %v332_v22 = vmul.f32 0.00390625, %v316_v21 }
  0xfe   : > { %v307_v23 = vpop.xlane.xlu1 %306  ;;  %v283_v24 = vpop.xlane.xlu0 %282 }
  0xff   : > { %v348_v27 = vsub.f32 %v332_v22, %v340_v18  ;;  %v317_v28 = vadd.f32 %v307_v23, %v283_v24 }
 0x100   : > { %v993_v29 = vpop.eup %992 }
 0x101   : > { %v356_v33 = vadd.f32 1e-05, %v348_v27  ;;  %v333_v34 = vmul.f32 0.00390625, %v317_v28  ;;  %v394_v35 = vmul.f32 %v993_v29, %v386_v26  ;;  %v378_v38 = vmul.f32 %v993_v29, %v370_v25 }
 0x102   : > { %v253_v39 = vpop.xlane.xlu1 %252  ;;  %v237_v41 = vpop.xlane.xlu0 %236 }
 0x103   : > { %996 = vrsqrt.f32 %v356_v33  ;;  %v349_v8 = vsub.f32 %v333_v34, %v341_v32  ;;  %874 = vmatprep.mubr.f32.mxu0 %v394_v35  ;;  %918 = vmatprep.mubr.f32.mxu1 %v378_v38  ;;  %v262_v45 = vadd.f32 %v253_v39, %v237_v41 }
 0x104   : > { %v995_v40 = vpop.eup %994 }
 0x105   : > { %v357_v43 = vadd.f32 1e-05, %v349_v8  ;;  %v395_v46 = vmul.f32 %v995_v40, %v387_v9  ;;  %v379_v47 = vmul.f32 %v995_v40, %v371_v42  ;;  %v326_v53 = vmul.f32 0.00390625, %v262_v45 }
 0x106   : > { %v255_v48 = vpop.xlane.xlu1 %254  ;;  %v239_v49 = vpop.xlane.xlu0 %238 }
 0x107   : > { %998 = vrsqrt.f32 %v357_v43  ;;  %875 = vmatmul.mubr.f32.gmra.mxu0 %v395_v46  ;;  %919 = vmatmul.mubr.f32.gmra.mxu1 %v379_v47  ;;  %v263_v52 = vadd.f32 %v255_v48, %v239_v49  ;;  %v342_v44 = vmul.f32 %v326_v53, %v326_v53  ;;  %v374_v19 = vsub.f32 %v1367_v51, %v326_v53 }
 0x108   : > { %v390_v20 = vsub.f32 %v1364_v50, %v326_v53  ;;  %v782_v50 = vld [vmem:[%s1481_s2] ss:$0 sm:$0xff] }
 0x109   : > { %v327_v14 = vmul.f32 0.00390625, %v263_v52 }
 0x10a   : > { %v309_v15 = vpop.xlane.xlu1 %308  ;;  %v285_v54 = vpop.xlane.xlu0 %284 }
 0x10b   : > { %v318_v55 = vadd.f32 %v309_v15, %v285_v54  ;;  %v343_v6 = vmul.f32 %v327_v14, %v327_v14  ;;  %v375_v36 = vsub.f32 %v1375_v57, %v327_v14  ;;  %v391_v2 = vsub.f32 %v1372_v56, %v327_v14 }
 0x10d   : > { %v334_v58 = vmul.f32 0.00390625, %v318_v55 }
 0x10e   : > { %v311_v59 = vpop.xlane.xlu1 %310  ;;  %v287_v60 = vpop.xlane.xlu0 %286 }
 0x10f   : > { %v350_v63 = vsub.f32 %v334_v58, %v342_v44  ;;  %v319_v4 = vadd.f32 %v311_v59, %v287_v60 }
 0x110   : > { %v997_v5 = vpop.eup %996 }
 0x111   : > { %v358_v7 = vadd.f32 1e-05, %v350_v63  ;;  %v335_v3 = vmul.f32 0.00390625, %v319_v4  ;;  %v396_v1 = vmul.f32 %v997_v5, %v388_v62  ;;  %v380_v10 = vmul.f32 %v997_v5, %v372_v61 }
 0x113   : > { %1000 = vrsqrt.f32 %v358_v7  ;;  %v351_v13 = vsub.f32 %v335_v3, %v343_v6  ;;  %877 = vmatprep.mubr.f32.mxu0 %v396_v1  ;;  %921 = vmatprep.mubr.f32.mxu1 %v380_v10 }
 0x114   : > { %v999_v31 = vpop.eup %998 }
 0x115   : > { %v359_v30 = vadd.f32 1e-05, %v351_v13  ;;  %v397_v16 = vmul.f32 %v999_v31, %v389_v12  ;;  %v381_v17 = vmul.f32 %v999_v31, %v373_v11 }
 0x117   : > { %1002 = vrsqrt.f32 %v359_v30  ;;  %878 = vmatmul.mubr.f32.gmra.mxu0 %v397_v16  ;;  %922 = vmatmul.mubr.f32.gmra.mxu1 %v381_v17 }
 0x120   : > { %v1001_v37 = vpop.eup %1000 }
 0x121   : > { %v398_v0 = vmul.f32 %v1001_v37, %v390_v20  ;;  %v382_v21 = vmul.f32 %v1001_v37, %v374_v19 }
 0x123   : > { %880 = vmatprep.mubr.f32.mxu0 %v398_v0  ;;  %924 = vmatprep.mubr.f32.mxu1 %v382_v21 }
 0x124   : > { %v1003_v18 = vpop.eup %1002 }
 0x125   : > { %v399_v22 = vmul.f32 %v1003_v18, %v391_v2  ;;  %v383_v23 = vmul.f32 %v1003_v18, %v375_v36 }
 0x127   : > { %881 = vmatmul.mubr.f32.gmra.mxu0 %v399_v22  ;;  %925 = vmatmul.mubr.f32.gmra.mxu1 %v383_v23 }
 0x1b7   : > { %v873_v24 = vpop.f32.mrf.mxu0  ;;  %v917_v25 = vpop.f32.mrf.mxu1 }
 0x1b8   : > { %v609_v51 = vadd.f32 %v917_v25, %v873_v24 }
 0x1b9   : > { %v498_v26 = vpop.f32.mrf.mxu0  ;;  %v603_v27 = vpop.f32.mrf.mxu1 }
 0x1ba   : > { %v650_v57 = vadd.f32 %v782_v50, %v609_v51  ;;  %v604_v28 = vadd.f32 %v603_v27, %v498_v26 }
 0x1bc   : > { %658 = vst [vmem:[%s1419_s29 + $0x8] sm:$0xff] %v650_v57  ;;  %v649_v56 = vadd.f32 %v782_v50, %v604_v28 }
 0x1be   : > { %657 = vst [vmem:[%s1419_s29] sm:$0xff] %v649_v56 }
 0x1c7   : > { %v876_v29 = vpop.f32.mrf.mxu0  ;;  %v920_v32 = vpop.f32.mrf.mxu1 }
 0x1c8   : > { %v619_v33 = vadd.f32 %v920_v32, %v876_v29 }
 0x1c9   : > { %v508_v34 = vpop.f32.mrf.mxu0  ;;  %v613_v35 = vpop.f32.mrf.mxu1 }
 0x1ca   : > { %v652_v38 = vadd.f32 %v782_v50, %v619_v33  ;;  %v614_v39 = vadd.f32 %v613_v35, %v508_v34 }
 0x1cc   : > { %660 = vst [vmem:[%s1419_s29 + $0x18] sm:$0xff] %v652_v38  ;;  %v651_v41 = vadd.f32 %v782_v50, %v614_v39 }
 0x1ce   : > { %659 = vst [vmem:[%s1419_s29 + $0x10] sm:$0xff] %v651_v41 }
 0x1d7   : > { %v879_v42 = vpop.f32.mrf.mxu0  ;;  %v923_v9 = vpop.f32.mrf.mxu1 }
 0x1d8   : > { %v629_v8 = vadd.f32 %v923_v9, %v879_v42 }
 0x1d9   : > { %v518_v40 = vpop.f32.mrf.mxu0  ;;  %v623_v43 = vpop.f32.mrf.mxu1 }
 0x1da   : > { %v654_v45 = vadd.f32 %v782_v50, %v629_v8  ;;  %v624_v46 = vadd.f32 %v623_v43, %v518_v40 }
 0x1dc   : > { %662 = vst [vmem:[%s1419_s29 + $0x28] sm:$0xff] %v654_v45  ;;  %v653_v47 = vadd.f32 %v782_v50, %v624_v46 }
 0x1de   : > { %661 = vst [vmem:[%s1419_s29 + $0x20] sm:$0xff] %v653_v47 }
 0x1e7   : > { %v882_v48 = vpop.f32.mrf.mxu0  ;;  %v926_v49 = vpop.f32.mrf.mxu1 }
 0x1e8   : > { %v639_v52 = vadd.f32 %v926_v49, %v882_v48 }
 0x1e9   : > { %v528_v53 = vpop.f32.mrf.mxu0  ;;  %v633_v15 = vpop.f32.mrf.mxu1 }
 0x1ea   : > { %v656_v54 = vadd.f32 %v782_v50, %v639_v52  ;;  %v634_v55 = vadd.f32 %v633_v15, %v528_v53 }
 0x1ec   : > { %664 = vst [vmem:[%s1419_s29 + $0x38] sm:$0xff] %v656_v54  ;;  %v655_v14 = vadd.f32 %v782_v50, %v634_v55 }
 0x1ee   : > { %663 = vst [vmem:[%s1419_s29 + $0x30] sm:$0xff] %v655_v14 }
 0x1ef   : > { %1071 = shalt.err (!%p1068_p0)
}
 0x1f0   : > { %s1072_s21 = scalar_lea.hbm %s1434_s8, 1024  ;;  %s1076_s4 = scalar_lea.hbm %s1482_s3, 2048 }
 0x1f1   : > { %p1073_p5 = scmp.ne.s32.totalorder %s1434_s8, %s1072_s21  ;;  %p1077_p4 = scmp.lt.s32.totalorder %s1434_s8, %s1482_s3 }
 0x1f2   : > { %p1078_p6 = scmp.lt.s32.totalorder %s1076_s4, %s1072_s21 }
 0x1f3   : > { %p1074_p2 = pnand %p1073_p5, %p1498_p11 }
 0x1f4   : > { %p1079_p8 = por %p1078_p6, %p1077_p4 }
 0x1f5   : > { %p1075_p1 = pneg %p1074_p2 }
 0x1f7   : > { %p1080_p3 = pnand %p1079_p8, %p1075_p1 }
 0x1f9   : > { %1083 = shalt.err (!%p1080_p3)
}
 0x1fa   : > { %s1133_s28 = smov 128   ;;  %s1134_s29 = smov 8  }
 0x1fb   : > { %933 = dma.vmem_to_hbm [thread:$0]  (%p1498_p11), %s1429_s17, 1024, %s1434_s8, %s666_s9, %s1133_s28, %s1133_s28, %s1134_s29  }
 0x1fc PF: > { %s694_s22 = sand.u32 1, %s1114_s12   ;;  %p1499_p7 = scmp.ne.s32.totalorder %s1488_s19, 0 }
 0x1fd   : > { %p1500_p9 = scmp.ge.s32.totalorder %s1126_s15, 2  ;;  %s695_s23 = scalar_lea.sflag [#allocation4], %s694_s22 }
 0x1ff   : > { %p944_p10 = pnand %p1500_p9, %p1499_p7 }
 0x201   : > { %p945_p12 = pneg %p944_p10 }
 0x203   : > { %1109 = dma.done.wait (%p945_p12), %s695_s23, 1024  }
 0x204   : > { %1111 = vsyncadd (%p945_p12), %s695_s23, 4294966272  ;;  %p17_p13 = scmp.ge.s32.totalorder %s1209_s24, 4   ;;  %s1501_s12 = smov %s1118_s13 }
 0x205   : > { %s1502_s13 = smov %s1122_s14  ;;  %s1503_s14 = smov %s1229_s5 }
 0x206   : > { %s1504_s15 = smov %s1209_s24  ;;  %19 = sbr.rel (!%p17_p13) target bundleno = 6 (0x6), region = 82 }
 0x20b   :  { %700 = vsyncpa [#allocation3], 1 }
 0x20c   :  { %702 = vsyncpa [#allocation3 + $0x1], 1 }
 0x20d   :  { %703 = vsyncpa [#allocation6], 1 }
 0x20e   :  { %704 = vsyncpa [#allocation4], 1 }
 0x20f   :  { %706 = vsyncpa [#allocation4 + $0x1], 1 }

</bundles_post_ra>
